<compile_context>
chip_gen: v7x
topology: tpu7x:2x2x1
jax: 0.10.0
libtpu: 0.0.40
codegen_flags: <defaults>
</compile_context>

<pallas_src>
import functools
import math

import jax
import jax.numpy as jnp
from jax import lax
from jax.experimental import pallas as pl
from jax.experimental.pallas import tpu as pltpu


_KRON_K_MAX = 16          # use the kron-factored kernel for K <= this
_DEFAULT_TILE_ROWS = 256  # row tile; multiple of 16 for bf16 sublane packing


def _round_up(a: int, b: int) -> int:
    return ((a + b - 1) // b) * b


def _sylvester_hadamard(m: int) -> jnp.ndarray:
    """H_m[u, t] = (-1)^popcount(u & t)  (natural / Sylvester ordering), m = 2^p."""
    idx = jnp.arange(m, dtype=jnp.uint32)
    pc = lax.population_count(idx[:, None] & idx[None, :])
    return jnp.where(pc % 2 == 0, 1.0, -1.0).astype(jnp.float32)


# --------------------------- kron-factored kernel -----------------------------

def _hadamard_kron_kernel(had_ref, x_ref, h_ref, o_ref, *, K, m, inv_sqrt_n,
                          mxu_dtype):
    # had_ref: (K, K) f32 scalars in SMEM (scalar prefetch)
    # x_ref:   (tile_rows, n) input tile, n = K * m
    # h_ref:   (m, m) +/-1 Hadamard factor (mxu_dtype), resident across the grid
    h = h_ref[...]
    # Step 1: per-group Hadamard transform on the MXU, f32 accumulation.
    zs = []
    for j in range(K):
        xj = x_ref[:, j * m:(j + 1) * m].astype(mxu_dtype)
        zs.append(jnp.dot(xj, h, preferred_element_type=jnp.float32))
    # Step 2: mix the K groups with the (exact +/-1) had_K scalars on the VPU,
    # scale once by 1/sqrt(n) in f32, write in the output dtype.
    for k in range(K):
        acc = had_ref[k, 0] * zs[0]
        for j in range(1, K):
            acc = acc + had_ref[k, j] * zs[j]
        o_ref[:, k * m:(k + 1) * m] = (acc * inv_sqrt_n).astype(o_ref.dtype)


# ------------------------- dense tiled-matmul fallback ------------------------

def _dense_matmul_kernel(x_ref, w_ref, o_ref, acc_ref, *, inv_sqrt_n, mxu_dtype):
    @pl.when(pl.program_id(2) == 0)
    def _():
        acc_ref[...] = jnp.zeros_like(acc_ref)

    acc_ref[...] += jnp.dot(x_ref[...].astype(mxu_dtype), w_ref[...],
                            preferred_element_type=jnp.float32)

    @pl.when(pl.program_id(2) == pl.num_programs(2) - 1)
    def _():
        o_ref[...] = (acc_ref[...] * inv_sqrt_n).astype(o_ref.dtype)


def _pick_lane_tile(n: int, cap: int = 512) -> int:
    """Largest nice tile that divides n (ragged reduction blocks are unsafe)."""
    if n <= cap or n % 128 != 0:
        return n
    for t in (512, 384, 256, 128):
        if t <= cap and n % t == 0:
            return t
    return n


# ----------------------------------- wrapper ----------------------------------

def hadamard_multiplier(x, had_K, K, use_fp32=False,
                        tile_rows=_DEFAULT_TILE_ROWS, mxu_dtype=jnp.bfloat16):
    """Pallas TPU implementation of HadamardMultiplier.forward / matmul_hadU.

    `use_fp32` is accepted for API parity: the kernel always uses bf16 MXU
    operands with f32 accumulation and returns x.dtype (matching the output
    dtype/semantics of both branches of the PyTorch module).
    """
    orig_dtype = x.dtype
    n = x.shape[-1]
    assert n % K == 0, "last dim must be divisible by K"
    m = n // K
    assert m & (m - 1) == 0, "n // K must be a power of two"

    rows = math.prod(x.shape[:-1])
    x2 = x.reshape(rows, n)                       # free reshape, no dtype copy
    had_K = jnp.asarray(had_K, jnp.float32).reshape(K, K)
    inv_sqrt_n = float(1.0 / math.sqrt(n))

    tm = min(_round_up(tile_rows, 16), _round_up(rows, 16))
    grid_m = pl.cdiv(rows, tm)

    if K <= _KRON_K_MAX:
        # kron-factored path: small (m, m) Hadamard factor stays resident in
        # VMEM; had_K scalars are prefetched into SMEM.
        h_fac = _sylvester_hadamard(m).astype(mxu_dtype)   # +/-1, exact in bf16
        kernel = functools.partial(_hadamard_kron_kernel, K=K, m=m,
                                   inv_sqrt_n=inv_sqrt_n, mxu_dtype=mxu_dtype)
        out = pl.pallas_call(
            kernel,
            out_shape=jax.ShapeDtypeStruct((rows, n), orig_dtype),
            grid_spec=pltpu.PrefetchScalarGridSpec(
                num_scalar_prefetch=1,
                grid=(grid_m,),
                in_specs=[
                    pl.BlockSpec((tm, n), lambda i, had: (i, 0)),   # x row tile
                    pl.BlockSpec((m, m), lambda i, had: (0, 0)),    # H factor
                ],
                out_specs=pl.BlockSpec((tm, n), lambda i, had: (i, 0)),
            ),
            compiler_params=pltpu.CompilerParams(
                dimension_semantics=("parallel",),
                vmem_limit_bytes=64 * 1024 * 1024,
            ),
        )(had_K, x2, h_fac)
    else:
        # Large-K fallback: dense W = kron(had_K, H).T (+/-1 entries, exact in
        # bf16) via the standard (M, N, K)-tiled matmul with f32 accumulator.
        w = jnp.kron(had_K, _sylvester_hadamard(m)).T.astype(mxu_dtype)  # (n, n)
        tn = tk = _pick_lane_tile(n)
        kernel = functools.partial(_dense_matmul_kernel,
                                   inv_sqrt_n=inv_sqrt_n, mxu_dtype=mxu_dtype)
        out = pl.pallas_call(
            kernel,
            out_shape=jax.ShapeDtypeStruct((rows, n), orig_dtype),
            grid_spec=pltpu.PrefetchScalarGridSpec(
                num_scalar_prefetch=0,
                grid=(grid_m, pl.cdiv(n, tn), n // tk),
                in_specs=[
                    pl.BlockSpec((tm, tk), lambda i, j, k: (i, k)),
                    pl.BlockSpec((tk, tn), lambda i, j, k: (k, j)),
                ],
                out_specs=pl.BlockSpec((tm, tn), lambda i, j, k: (i, j)),
                scratch_shapes=[pltpu.VMEM((tm, tn), jnp.float32)],
            ),
            compiler_params=pltpu.CompilerParams(
                dimension_semantics=("parallel", "parallel", "arbitrary"),
                vmem_limit_bytes=64 * 1024 * 1024,
            ),
        )(x2, w)

    return out.reshape(x.shape)


# ---------------------------- pure-JAX reference -------------------------------

def matmul_hadU_ref(x, had_K, K):
    """Faithful port of torchao's matmul_hadU (butterfly + had_K bmm)."""
    n = x.shape[-1]
    inp = x.reshape(-1, n, 1)
    while inp.shape[1] > K:
        b, c, d = inp.shape
        v = inp.reshape(b, c // 2, 2, d)
        top = v[:, :, 0, :] + v[:, :, 1, :]
        bot = v[:, :, 0, :] - v[:, :, 1, :]
        inp = jnp.concatenate(
            [top[:, :, None, :], bot[:, :, None, :]], axis=2
        ).reshape(b, c // 2, 2 * d)
    if K > 1:
        inp = jnp.einsum("kj,bjd->bkd", had_K.astype(inp.dtype), inp)
    return inp.reshape(x.shape) / jnp.sqrt(jnp.float32(n)).astype(x.dtype)


def hadamard_multiplier_ref(x, had_K, K, use_fp32=False):
    if use_fp32:
        return matmul_hadU_ref(x.astype(jnp.float32), had_K, K).astype(x.dtype)
    return matmul_hadU_ref(x, had_K, K)


# ------------------------------------- main ------------------------------------

if __name__ == "__main__":
    key = jax.random.PRNGKey(0)
    kx, kh, kh2, kx2 = jax.random.split(key, 4)

    # --- case 1: kron-factored path (batch=2, seq=8, hidden=32, K=4) ----------
    batch, seq, hidden, K = 2, 8, 32, 4
    had_K = jnp.where(jax.random.bernoulli(kh, 0.5, (K, K)), 1.0, -1.0
                      ).astype(jnp.float32)
    x = jax.random.normal(kx, (batch, seq, hidden), dtype=jnp.float32)

    out = jax.block_until_ready(hadamard_multiplier(x, had_K, K, use_fp32=False))
    ref = hadamard_multiplier_ref(x, had_K, K, use_fp32=False)
    assert out.shape == x.shape and out.dtype == x.dtype
    assert jnp.allclose(out, ref, rtol=3e-2, atol=3e-2), (
        f"kron path max abs err = {jnp.max(jnp.abs(out - ref))}")

    # bf16 input / use_fp32=True dtype plumbing
    xb = x.astype(jnp.bfloat16)
    outb = jax.block_until_ready(hadamard_multiplier(xb, had_K, K, use_fp32=True))
    refb = hadamard_multiplier_ref(xb, had_K, K, use_fp32=True)
    assert outb.dtype == jnp.bfloat16
    assert jnp.allclose(outb.astype(jnp.float32), refb.astype(jnp.float32),
                        rtol=5e-2, atol=5e-2)

    # --- case 2: dense tiled fallback (hidden=64, K=64 -> m=1) ----------------
    K2, hidden2 = 64, 64
    had_K2 = jnp.where(jax.random.bernoulli(kh2, 0.5, (K2, K2)), 1.0, -1.0
                       ).astype(jnp.float32)
    x_b = jax.random.normal(kx2, (batch, seq, hidden2), dtype=jnp.float32)
    out2 = jax.block_until_ready(hadamard_multiplier(x_b, had_K2, K2))
    ref2 = hadamard_multiplier_ref(x_b, had_K2, K2)
    assert out2.shape == x_b.shape and out2.dtype == x_b.dtype
    assert jnp.allclose(out2, ref2, rtol=3e-2, atol=3e-2), (
        f"dense path max abs err = {jnp.max(jnp.abs(out2 - ref2))}")

    print("KERNEL_OK")
</pallas_src>

<mosaic_0001>
module attributes {stable_mosaic.version = 11 : i64} {
  func.func @_hadamard_kron_kernel(%arg0: i32, %arg1: memref<4x4xf32, #tpu.memory_space<smem>>, %arg2: memref<16x32xf32, #tpu.memory_space<vmem>>, %arg3: memref<8x8xbf16, #tpu.memory_space<vmem>>, %arg4: memref<16x32xf32, #tpu.memory_space<vmem>>) attributes {dimension_semantics = [#tpu.dimension_semantics<parallel>], iteration_bounds = array<i64: 1>, scalar_prefetch = 1 : i64, scratch_operands = 0 : i64, tpu.core_type = #tpu.core_type<tc>, window_params = [{transform_indices = @transform_0, window_bounds = array<i64: 16, 32>}, {pipeline_mode = #tpu.pipeline_mode<synchronous>, transform_indices = @transform_1, window_bounds = array<i64: 8, 8>}, {transform_indices = @transform_2, window_bounds = array<i64: 16, 32>}]} {
    %c0 = arith.constant 0 : index
    %c0_0 = arith.constant 0 : index
    %0 = vector.load %arg3[%c0, %c0_0] : memref<8x8xbf16, #tpu.memory_space<vmem>>, vector<8x8xbf16>
    %c0_1 = arith.constant 0 : index
    %c0_2 = arith.constant 0 : index
    %1 = vector.load %arg2[%c0_1, %c0_2] : memref<16x32xf32, #tpu.memory_space<vmem>>, vector<16x8xf32>
    %2 = arith.truncf %1 : vector<16x8xf32> to vector<16x8xbf16>
    %cst = arith.constant dense<0.000000e+00> : vector<16x8xf32>
    %3 = tpu.matmul %2, %0, %cst {dimension_numbers = #tpu.dot_dimension_numbers<[1], [0], [0], [1], [0, 0, 1, 1], [], []>} : vector<16x8xbf16>, vector<8x8xbf16>, vector<16x8xf32> -> vector<16x8xf32>
    %c0_3 = arith.constant 0 : index
    %c8 = arith.constant 8 : index
    %4 = vector.load %arg2[%c0_3, %c8] : memref<16x32xf32, #tpu.memory_space<vmem>>, vector<16x8xf32>
    %5 = arith.truncf %4 : vector<16x8xf32> to vector<16x8xbf16>
    %cst_4 = arith.constant dense<0.000000e+00> : vector<16x8xf32>
    %6 = tpu.matmul %5, %0, %cst_4 {dimension_numbers = #tpu.dot_dimension_numbers<[1], [0], [0], [1], [0, 0, 1, 1], [], []>} : vector<16x8xbf16>, vector<8x8xbf16>, vector<16x8xf32> -> vector<16x8xf32>
    %c0_5 = arith.constant 0 : index
    %c16 = arith.constant 16 : index
    %7 = vector.load %arg2[%c0_5, %c16] : memref<16x32xf32, #tpu.memory_space<vmem>>, vector<16x8xf32>
    %8 = arith.truncf %7 : vector<16x8xf32> to vector<16x8xbf16>
    %cst_6 = arith.constant dense<0.000000e+00> : vector<16x8xf32>
    %9 = tpu.matmul %8, %0, %cst_6 {dimension_numbers = #tpu.dot_dimension_numbers<[1], [0], [0], [1], [0, 0, 1, 1], [], []>} : vector<16x8xbf16>, vector<8x8xbf16>, vector<16x8xf32> -> vector<16x8xf32>
    %c0_7 = arith.constant 0 : index
    %c24 = arith.constant 24 : index
    %10 = vector.load %arg2[%c0_7, %c24] : memref<16x32xf32, #tpu.memory_space<vmem>>, vector<16x8xf32>
    %11 = arith.truncf %10 : vector<16x8xf32> to vector<16x8xbf16>
    %cst_8 = arith.constant dense<0.000000e+00> : vector<16x8xf32>
    %12 = tpu.matmul %11, %0, %cst_8 {dimension_numbers = #tpu.dot_dimension_numbers<[1], [0], [0], [1], [0, 0, 1, 1], [], []>} : vector<16x8xbf16>, vector<8x8xbf16>, vector<16x8xf32> -> vector<16x8xf32>
    %c0_9 = arith.constant 0 : index
    %c0_10 = arith.constant 0 : index
    %13 = memref.load %arg1[%c0_9, %c0_10] : memref<4x4xf32, #tpu.memory_space<smem>>
    %14 = vector.broadcast %13 : f32 to vector<16x8xf32>
    %15 = arith.mulf %14, %3 : vector<16x8xf32>
    %c0_11 = arith.constant 0 : index
    %c1 = arith.constant 1 : index
    %16 = memref.load %arg1[%c0_11, %c1] : memref<4x4xf32, #tpu.memory_space<smem>>
    %17 = vector.broadcast %16 : f32 to vector<16x8xf32>
    %18 = arith.mulf %17, %6 : vector<16x8xf32>
    %19 = arith.addf %15, %18 : vector<16x8xf32>
    %c0_12 = arith.constant 0 : index
    %c2 = arith.constant 2 : index
    %20 = memref.load %arg1[%c0_12, %c2] : memref<4x4xf32, #tpu.memory_space<smem>>
    %21 = vector.broadcast %20 : f32 to vector<16x8xf32>
    %22 = arith.mulf %21, %9 : vector<16x8xf32>
    %23 = arith.addf %19, %22 : vector<16x8xf32>
    %c0_13 = arith.constant 0 : index
    %c3 = arith.constant 3 : index
    %24 = memref.load %arg1[%c0_13, %c3] : memref<4x4xf32, #tpu.memory_space<smem>>
    %25 = vector.broadcast %24 : f32 to vector<16x8xf32>
    %26 = arith.mulf %25, %12 : vector<16x8xf32>
    %27 = arith.addf %23, %26 : vector<16x8xf32>
    %cst_14 = arith.constant 0.176776692 : f32
    %28 = vector.broadcast %cst_14 : f32 to vector<16x8xf32>
    %29 = arith.mulf %27, %28 : vector<16x8xf32>
    %c0_15 = arith.constant 0 : index
    %c0_16 = arith.constant 0 : index
    %30 = vector.load %arg4[%c0_15, %c0_16] : memref<16x32xf32, #tpu.memory_space<vmem>>, vector<16x8xf32>
    tpu.vector_store %arg4[%c0_15, %c0_16], %29 {strides = array<i32>} : memref<16x32xf32, #tpu.memory_space<vmem>>, vector<16x8xf32>,
    %c1_17 = arith.constant 1 : index
    %c0_18 = arith.constant 0 : index
    %31 = memref.load %arg1[%c1_17, %c0_18] : memref<4x4xf32, #tpu.memory_space<smem>>
    %32 = vector.broadcast %31 : f32 to vector<16x8xf32>
    %33 = arith.mulf %32, %3 : vector<16x8xf32>
    %c1_19 = arith.constant 1 : index
    %c1_20 = arith.constant 1 : index
    %34 = memref.load %arg1[%c1_19, %c1_20] : memref<4x4xf32, #tpu.memory_space<smem>>
    %35 = vector.broadcast %34 : f32 to vector<16x8xf32>
    %36 = arith.mulf %35, %6 : vector<16x8xf32>
    %37 = arith.addf %33, %36 : vector<16x8xf32>
    %c1_21 = arith.constant 1 : index
    %c2_22 = arith.constant 2 : index
    %38 = memref.load %arg1[%c1_21, %c2_22] : memref<4x4xf32, #tpu.memory_space<smem>>
    %39 = vector.broadcast %38 : f32 to vector<16x8xf32>
    %40 = arith.mulf %39, %9 : vector<16x8xf32>
    %41 = arith.addf %37, %40 : vector<16x8xf32>
    %c1_23 = arith.constant 1 : index
    %c3_24 = arith.constant 3 : index
    %42 = memref.load %arg1[%c1_23, %c3_24] : memref<4x4xf32, #tpu.memory_space<smem>>
    %43 = vector.broadcast %42 : f32 to vector<16x8xf32>
    %44 = arith.mulf %43, %12 : vector<16x8xf32>
    %45 = arith.addf %41, %44 : vector<16x8xf32>
    %cst_25 = arith.constant 0.176776692 : f32
    %46 = vector.broadcast %cst_25 : f32 to vector<16x8xf32>
    %47 = arith.mulf %45, %46 : vector<16x8xf32>
    %c0_26 = arith.constant 0 : index
    %c8_27 = arith.constant 8 : index
    %48 = vector.load %arg4[%c0_26, %c8_27] : memref<16x32xf32, #tpu.memory_space<vmem>>, vector<16x8xf32>
    tpu.vector_store %arg4[%c0_26, %c8_27], %47 {strides = array<i32>} : memref<16x32xf32, #tpu.memory_space<vmem>>, vector<16x8xf32>,
    %c2_28 = arith.constant 2 : index
    %c0_29 = arith.constant 0 : index
    %49 = memref.load %arg1[%c2_28, %c0_29] : memref<4x4xf32, #tpu.memory_space<smem>>
    %50 = vector.broadcast %49 : f32 to vector<16x8xf32>
    %51 = arith.mulf %50, %3 : vector<16x8xf32>
    %c2_30 = arith.constant 2 : index
    %c1_31 = arith.constant 1 : index
    %52 = memref.load %arg1[%c2_30, %c1_31] : memref<4x4xf32, #tpu.memory_space<smem>>
    %53 = vector.broadcast %52 : f32 to vector<16x8xf32>
    %54 = arith.mulf %53, %6 : vector<16x8xf32>
    %55 = arith.addf %51, %54 : vector<16x8xf32>
    %c2_32 = arith.constant 2 : index
    %c2_33 = arith.constant 2 : index
    %56 = memref.load %arg1[%c2_32, %c2_33] : memref<4x4xf32, #tpu.memory_space<smem>>
    %57 = vector.broadcast %56 : f32 to vector<16x8xf32>
    %58 = arith.mulf %57, %9 : vector<16x8xf32>
    %59 = arith.addf %55, %58 : vector<16x8xf32>
    %c2_34 = arith.constant 2 : index
    %c3_35 = arith.constant 3 : index
    %60 = memref.load %arg1[%c2_34, %c3_35] : memref<4x4xf32, #tpu.memory_space<smem>>
    %61 = vector.broadcast %60 : f32 to vector<16x8xf32>
    %62 = arith.mulf %61, %12 : vector<16x8xf32>
    %63 = arith.addf %59, %62 : vector<16x8xf32>
    %cst_36 = arith.constant 0.176776692 : f32
    %64 = vector.broadcast %cst_36 : f32 to vector<16x8xf32>
    %65 = arith.mulf %63, %64 : vector<16x8xf32>
    %c0_37 = arith.constant 0 : index
    %c16_38 = arith.constant 16 : index
    %66 = vector.load %arg4[%c0_37, %c16_38] : memref<16x32xf32, #tpu.memory_space<vmem>>, vector<16x8xf32>
    tpu.vector_store %arg4[%c0_37, %c16_38], %65 {strides = array<i32>} : memref<16x32xf32, #tpu.memory_space<vmem>>, vector<16x8xf32>,
    %c3_39 = arith.constant 3 : index
    %c0_40 = arith.constant 0 : index
    %67 = memref.load %arg1[%c3_39, %c0_40] : memref<4x4xf32, #tpu.memory_space<smem>>
    %68 = vector.broadcast %67 : f32 to vector<16x8xf32>
    %69 = arith.mulf %68, %3 : vector<16x8xf32>
    %c3_41 = arith.constant 3 : index
    %c1_42 = arith.constant 1 : index
    %70 = memref.load %arg1[%c3_41, %c1_42] : memref<4x4xf32, #tpu.memory_space<smem>>
    %71 = vector.broadcast %70 : f32 to vector<16x8xf32>
    %72 = arith.mulf %71, %6 : vector<16x8xf32>
    %73 = arith.addf %69, %72 : vector<16x8xf32>
    %c3_43 = arith.constant 3 : index
    %c2_44 = arith.constant 2 : index
    %74 = memref.load %arg1[%c3_43, %c2_44] : memref<4x4xf32, #tpu.memory_space<smem>>
    %75 = vector.broadcast %74 : f32 to vector<16x8xf32>
    %76 = arith.mulf %75, %9 : vector<16x8xf32>
    %77 = arith.addf %73, %76 : vector<16x8xf32>
    %c3_45 = arith.constant 3 : index
    %c3_46 = arith.constant 3 : index
    %78 = memref.load %arg1[%c3_45, %c3_46] : memref<4x4xf32, #tpu.memory_space<smem>>
    %79 = vector.broadcast %78 : f32 to vector<16x8xf32>
    %80 = arith.mulf %79, %12 : vector<16x8xf32>
    %81 = arith.addf %77, %80 : vector<16x8xf32>
    %cst_47 = arith.constant 0.176776692 : f32
    %82 = vector.broadcast %cst_47 : f32 to vector<16x8xf32>
    %83 = arith.mulf %81, %82 : vector<16x8xf32>
    %c0_48 = arith.constant 0 : index
    %c24_49 = arith.constant 24 : index
    %84 = vector.load %arg4[%c0_48, %c24_49] : memref<16x32xf32, #tpu.memory_space<vmem>>, vector<16x8xf32>
    tpu.vector_store %arg4[%c0_48, %c24_49], %83 {strides = array<i32>} : memref<16x32xf32, #tpu.memory_space<vmem>>, vector<16x8xf32>,
    return
  }
  func.func @transform_0(%arg0: i32, %arg1: memref<4x4xf32, #tpu.memory_space<smem>>) -> (i32, i32) {
    %c0_i32 = arith.constant 0 : i32
    %c0_i32_0 = arith.constant 0 : i32
    return %arg0, %c0_i32 : i32, i32
  }
  func.func @transform_1(%arg0: i32, %arg1: memref<4x4xf32, #tpu.memory_space<smem>>) -> (i32, i32) {
    %c0_i32 = arith.constant 0 : i32
    %c0_i32_0 = arith.constant 0 : i32
    %c0_i32_1 = arith.constant 0 : i32
    return %c0_i32, %c0_i32_0 : i32, i32
  }
  func.func @transform_2(%arg0: i32, %arg1: memref<4x4xf32, #tpu.memory_space<smem>>) -> (i32, i32) {
    %c0_i32 = arith.constant 0 : i32
    %c0_i32_0 = arith.constant 0 : i32
    return %arg0, %c0_i32 : i32, i32
  }
}

</mosaic_0001>

<bundles_post_ra>
// kernel: tpu_custom_call.1
= control target key start
LH: loop header
LB: loop body
LE: loop exit
PB: predicated region body
PF: predicated region fallthrough
CT: control target
= control target key end

     0   :  { %s680_s0 = inlined_call_operand.hbm [shape: f32[4,4], index: 0, kind: input, shape index: {}]   ;;  %s681_s1 = inlined_call_operand.hbm [shape: f32[16,32], index: 1, kind: input, shape index: {}]   ;;  %s682_s2 = inlined_call_operand.hbm [shape: bf16[8,8], index: 2, kind: input, shape index: {}]   ;;  %s683_s3 = inlined_call_operand.hbm [shape: f32[16,32], index: 3, kind: output, shape index: {}]  }
   0x1   :  { %s449_s14 = scalar_lea.hbm %s680_s0, 64 }
   0x2   :  { %p450_p0 = scmp.ne.s32.totalorder %s680_s0, %s449_s14  ;;  %p453_p1 = scmp.lt.u32.totalorder %s449_s14, %s680_s0 }
   0x4   :  { %p455_p2 = pnand %p453_p1, %p450_p0 }
   0x6   :  { %458 = shalt.err (!%p455_p2)  }
   0x7   :  { %s533_s19 = smov [#allocation3]  }
   0x8   :  { %9 = dma.hbm_to_smem %s680_s0, 64, %s533_s19, [#allocation2] }
   0x9   :  { %525 = dma.done.wait [#allocation2], 64 }
   0xa   :  { %526 = vsyncadd [#allocation2], 4294967232 }
   0xb   :  { %11 = sfence }
   0xc   :  { %12 = vsyncpa [#allocation5], 0 }
   0xd   :  { %13 = vsyncpa [#allocation8], 0 }
   0xe   :  { %14 = vsyncpa [#allocation6], 0  ;;  %s534_s22 = smov [#allocation4]   ;;  %s459_s26 = scalar_lea.hbm %s681_s1, 256 }
   0xf   :  { %s20_s23 = sshll.u32 %s534_s22, 4  ;;  %p460_p3 = scmp.ne.s32.totalorder %s681_s1, %s459_s26  ;;  %s21_s23 = int_to_ptr.vmem [resolvable:$true] %s20_s23 }
  0x10   :  { %p463_p4 = scmp.lt.u32.totalorder %s459_s26, %s681_s1 }
  0x12   :  { %p465_p5 = pnand %p463_p4, %p460_p3 }
  0x14   :  { %468 = shalt.err (!%p465_p5)
}
  0x15   :  { %s469_s0 = scalar_lea.vmem %s21_s23, 256  ;;  %p474_p7 = scmp.lt.s32.totalorder %s21_s23, %s21_s23 }
  0x16   :  { %p470_p6 = scmp.ne.s32.totalorder %s21_s23, %s469_s0  ;;  %p475_p8 = scmp.lt.s32.totalorder %s469_s0, %s469_s0 }
  0x18   :  { %p476_p9 = por %p475_p8, %p474_p7 }
  0x1a   :  { %p477_p10 = pnand %p476_p9, %p470_p6 }
  0x1c   :  { %480 = shalt.err (!%p477_p10)
}
  0x1d   :  { %s535_s4 = smov 128   ;;  %s536_s5 = smov 8  }
  0x1e   :  { %26 = dma.hbm_to_vmem [thread:$0]  %s681_s1, 256, %s21_s23, [#allocation5], %s535_s4, %s535_s4, %s536_s5  }
  0x1f   :  { %s537_s8 = smov [#allocation7]   ;;  %s481_s12 = scalar_lea.hbm %s682_s2, 64 }
  0x20   :  { %s33_s9 = sshll.u32 %s537_s8, 4  ;;  %p482_p11 = scmp.ne.s32.totalorder %s682_s2, %s481_s12  ;;  %s34_s9 = int_to_ptr.vmem [resolvable:$true] %s33_s9 }
  0x21   :  { %p485_p12 = scmp.lt.u32.totalorder %s481_s12, %s682_s2 }
  0x23   :  { %p487_p13 = pnand %p485_p12, %p482_p11 }
  0x25   :  { %490 = shalt.err (!%p487_p13)
}
  0x26   :  { %s491_s17 = scalar_lea.vmem %s34_s9, 64  ;;  %p496_p1 = scmp.lt.s32.totalorder %s34_s9, %s34_s9 }
  0x27   :  { %p492_p0 = scmp.ne.s32.totalorder %s34_s9, %s491_s17  ;;  %p497_p2 = scmp.lt.s32.totalorder %s491_s17, %s491_s17 }
  0x29   :  { %p498_p3 = por %p497_p2, %p496_p1 }
  0x2b   :  { %p499_p4 = pnand %p498_p3, %p492_p0 }
  0x2d   :  { %502 = shalt.err (!%p499_p4)
}
  0x2e   :  { %36 = dma.hbm_to_vmem [thread:$0]  %s682_s2, 64, %s34_s9, [#allocation8]  }
  0x2f   :  { %527 = dma.done.wait [#allocation5], 256  }
  0x30   :  { %528 = vsyncadd [#allocation5], 4294967040 }
  0x31   :  { %529 = dma.done.wait [#allocation8], 64  }
  0x32   :  { %530 = vsyncadd [#allocation8], 4294967232  ;;  %v538_v0 = vmov 0.0   ;;  %vm539_vm0 = vmmov 0   ;;  %vm52_vm1 = vcmask 1043456   ;;  %v45_v1 = vld [vmem:[#allocation4] sm:$0xff] }
  0x33   :  { %412 = vmatprep.subr.bf16.mxu0 %v538_v0  ;;  %418 = vmatprep.subr.bf16.mxu1 %v538_v0  ;;  %v46_v2 = vld [vmem:[#allocation4 + $0x8] sm:$0xff]  ;;  %v44_v3 = vld [vmem:[#allocation7] sm:$0xf]  ;;  %vm48_vm2 = vcmask 64512   ;;  %s540_s2 = smov 120   ;;  %s541_s19 = smov 104  }
  0x34   :  { %414 = vmatprep.mubr.msk.bf16.mxu0 %vm539_vm0, %v538_v0  ;;  %420 = vmatprep.mubr.msk.bf16.mxu1 %vm539_vm0, %v538_v0  ;;  %v47_v4 = vpack.c.bf16 %v46_v2, %v45_v1  ;;  %v54_v5 = vsel %vm52_vm1, %v44_v3, 0  ;;  %s542_s20 = smov 112   ;;  %s613_s21 = sld [smem:[#allocation3]]  ;;  %vm294_vm3 = vcmask 130112   ;;  %vm329_vm4 = vcmask 195712  }
  0x35   :  { %413 = vmatpush3.bf16.msra.mxu0 %v54_v5  ;;  %419 = vmatpush3.bf16.msra.mxu1 %v54_v5  ;;  %s615_s22 = sld [smem:[#allocation3 + $0x80]]  ;;  %s621_s25 = sld [smem:[#allocation3 + $0x1]]  ;;  %vm364_vm5 = vcmask 261312  }
  0x36   :  { %98 = vrot.lane.b32.xlu0 %v47_v4, %s540_s2  ;;  %190 = vrot.lane.b32.xlu1 %v47_v4, %s541_s19  ;;  %s617_s23 = sld [smem:[#allocation3 + $0x100]]  ;;  %s623_s26 = sld [smem:[#allocation3 + $0x81]] }
  0x37   :  { %424 = vmatprep.subr.bf16.mxu0 %v538_v0  ;;  %430 = vmatprep.subr.bf16.mxu1 %v538_v0  ;;  %s619_s24 = sld [smem:[#allocation3 + $0x180]]  ;;  %s625_s27 = sld [smem:[#allocation3 + $0x101]] }
  0x38   :  { %415 = vmatmul.mubr.msk.bf16.vlgmr.msra.gmra.mrb[0].mxu0 %vm48_vm2, %v47_v4  ;;  %s627_s28 = sld [smem:[#allocation3 + $0x181]]  ;;  %s629_s29 = sld [smem:[#allocation3 + $0x2]] }
  0x39   :  { %425 = vmatpush3.bf16.msra.mxu0 %v54_v5  ;;  %426 = vmatprep.mubr.msk.bf16.mxu0 %vm539_vm0, %v538_v0  ;;  %s631_s30 = sld [smem:[#allocation3 + $0x82]]  ;;  %s637_s7 = sld [smem:[#allocation3 + $0x3]] }
  0x3a   :  { %144 = vrot.lane.b32.xlu0 %v47_v4, %s542_s20  ;;  %s633_s0 = sld [smem:[#allocation3 + $0x102]]  ;;  %s639_s8 = sld [smem:[#allocation3 + $0x103]]  ;;  %v237_v13 = vstv %s613_s21 }
  0x3b   :  { %s635_s6 = sld [smem:[#allocation3 + $0x182]]  ;;  %s641_s9 = sld [smem:[#allocation3 + $0x183]]  ;;  %v263_v14 = vstv %s615_s22  ;;  %v241_v17 = vstv %s621_s25 }
  0x3c   :  { %s643_s10 = sld [smem:[#allocation3 + $0x83]]  ;;  %v298_v15 = vstv %s617_s23  ;;  %v267_v18 = vstv %s623_s26  ;;  %s543_s11 = smov 16  }
  0x3d   :  { %v333_v16 = vstv %s619_s24  ;;  %v302_v19 = vstv %s625_s27  ;;  %s544_s12 = smov 24   ;;  %s545_s13 = smov [#allocation9]  }
  0x3e   :  { %v337_v20 = vstv %s627_s28  ;;  %v247_v21 = vstv %s629_s29  ;;  %s372_s14 = sshll.u32 %s545_s13, 4  ;;  %s373_s14 = int_to_ptr.vmem [resolvable:$true] %s372_s14 }
  0x3f   :  { %v273_v22 = vstv %s631_s30  ;;  %v253_v25 = vstv %s637_s7  ;;  %s503_s15 = scalar_lea.vmem %s373_s14, 256  ;;  %p508_p6 = scmp.lt.s32.totalorder %s373_s14, %s373_s14 }
  0x40   :  { %v308_v23 = vstv %s633_s0  ;;  %v314_v26 = vstv %s639_s8  ;;  %p504_p5 = scmp.ne.s32.totalorder %s373_s14, %s503_s15  ;;  %p509_p7 = scmp.lt.s32.totalorder %s503_s15, %s503_s15 }
  0x41   :  { %v343_v24 = vstv %s635_s6  ;;  %v349_v27 = vstv %s641_s9 }
  0x42   :  { %v279_v28 = vstv %s643_s10  ;;  %p510_p8 = por %p509_p7, %p508_p6 }
  0x44   :  { %p511_p9 = pnand %p510_p8, %p504_p5 }
  0xa8   :  { %v99_v6 = vpop.permute.xlu0 %98  ;;  %v191_v8 = vpop.permute.xlu1 %190 }
  0xa9   :  { %421 = vmatmul.mubr.msk.bf16.vlgmr.msra.gmra.mrb[0].mxu1 %vm48_vm2, %v99_v6 }
  0xaa   :  { %431 = vmatpush3.bf16.msra.mxu1 %v54_v5  ;;  %432 = vmatprep.mubr.msk.bf16.mxu1 %vm539_vm0, %v538_v0 }
  0xac   :  { %v145_v7 = vpop.permute.xlu0 %144 }
  0xad   :  { %427 = vmatmul.mubr.msk.bf16.vlgmr.msra.gmra.mrb[4].mxu0 %vm48_vm2, %v145_v7 }
  0xb1   :  { %433 = vmatmul.mubr.msk.bf16.vlgmr.msra.gmra.mrb[4].mxu1 %vm48_vm2, %v191_v8 }
 0x10b   :  { %v90_v9 = vpop.f32.mrb[0].mxu0 }
 0x10c   :  { %v416_v10 = vpop.f32.mrb[1].mxu0  ;;  %v238_v29 = vmul.f32 %v237_v13, %v90_v9  ;;  %v264_v30 = vmul.f32 %v263_v14, %v90_v9  ;;  %v299_v31 = vmul.f32 %v298_v15, %v90_v9  ;;  %v334_v32 = vmul.f32 %v333_v16, %v90_v9 }
 0x10d   :  { %v93_v11 = vpop.f32.mrb[2].mxu0 }
 0x10e   :  { %v417_v12 = vpop.f32.mrb[3].mxu0  ;;  %v239_v39 = vmul.f32 %v237_v13, %v93_v11  ;;  %v265_v40 = vmul.f32 %v263_v14, %v93_v11  ;;  %v300_v41 = vmul.f32 %v298_v15, %v93_v11  ;;  %v335_v42 = vmul.f32 %v333_v16, %v93_v11 }
 0x17c   :  { %v137_v33 = vpop.f32.mrb[0].mxu1 }
 0x17d   :  { %v242_v34 = vmul.f32 %v241_v17, %v137_v33  ;;  %v268_v35 = vmul.f32 %v267_v18, %v137_v33  ;;  %v303_v36 = vmul.f32 %v302_v19, %v137_v33  ;;  %v338_v37 = vmul.f32 %v337_v20, %v137_v33  ;;  %v422_v38 = vpop.f32.mrb[1].mxu1 }
 0x17e   :  { %v140_v43 = vpop.f32.mrb[2].mxu1 }
 0x17f   :  { %v244_v44 = vadd.f32 %v242_v34, %v238_v29  ;;  %v305_v45 = vadd.f32 %v303_v36, %v299_v31  ;;  %v340_v46 = vadd.f32 %v338_v37, %v334_v32  ;;  %v243_v47 = vmul.f32 %v241_v17, %v140_v43  ;;  %v423_v48 = vpop.f32.mrb[3].mxu1 }
 0x180   :  { %v269_v49 = vmul.f32 %v267_v18, %v140_v43  ;;  %v304_v50 = vmul.f32 %v302_v19, %v140_v43  ;;  %v339_v51 = vmul.f32 %v337_v20, %v140_v43  ;;  %v183_v52 = vpop.f32.mrb[4].mxu0  ;;  %v270_v53 = vadd.f32 %v268_v35, %v264_v30 }
 0x181   :  { %v245_v54 = vadd.f32 %v243_v47, %v239_v39  ;;  %v248_v55 = vmul.f32 %v247_v21, %v183_v52  ;;  %v274_v56 = vmul.f32 %v273_v22, %v183_v52  ;;  %v309_v57 = vmul.f32 %v308_v23, %v183_v52  ;;  %v428_v58 = vpop.f32.mrb[5].mxu0 }
 0x182   :  { %v306_v59 = vadd.f32 %v304_v50, %v300_v41  ;;  %v341_v60 = vadd.f32 %v339_v51, %v335_v42  ;;  %v344_v61 = vmul.f32 %v343_v24, %v183_v52  ;;  %v186_v62 = vpop.f32.mrb[6].mxu0  ;;  %v271_v63 = vadd.f32 %v269_v49, %v265_v40 }
 0x183   :  { %v250_v0 = vadd.f32 %v248_v55, %v244_v44  ;;  %v249_v1 = vmul.f32 %v247_v21, %v186_v62  ;;  %v275_v2 = vmul.f32 %v273_v22, %v186_v62  ;;  %v310_v3 = vmul.f32 %v308_v23, %v186_v62  ;;  %v429_v4 = vpop.f32.mrb[7].mxu0 }
 0x184   :  { %v345_v5 = vmul.f32 %v343_v24, %v186_v62  ;;  %v229_v6 = vpop.f32.mrb[4].mxu1  ;;  %v276_v7 = vadd.f32 %v274_v56, %v270_v53  ;;  %v311_v8 = vadd.f32 %v309_v57, %v305_v45  ;;  %v346_v9 = vadd.f32 %v344_v61, %v340_v46 }
 0x185   :  { %v251_v10 = vadd.f32 %v249_v1, %v245_v54  ;;  %v254_v11 = vmul.f32 %v253_v25, %v229_v6  ;;  %v315_v12 = vmul.f32 %v314_v26, %v229_v6  ;;  %v350_v13 = vmul.f32 %v349_v27, %v229_v6  ;;  %v434_v14 = vpop.f32.mrb[5].mxu1 }
 0x186   :  { %v232_v15 = vpop.f32.mrb[6].mxu1  ;;  %v280_v16 = vmul.f32 %v279_v28, %v229_v6  ;;  %v277_v17 = vadd.f32 %v275_v2, %v271_v63  ;;  %v312_v18 = vadd.f32 %v310_v3, %v306_v59  ;;  %v347_v19 = vadd.f32 %v345_v5, %v341_v60 }
 0x187   :  { %v256_v20 = vadd.f32 %v254_v11, %v250_v0  ;;  %v255_v21 = vmul.f32 %v253_v25, %v232_v15  ;;  %v316_v22 = vmul.f32 %v314_v26, %v232_v15  ;;  %v351_v23 = vmul.f32 %v349_v27, %v232_v15  ;;  %v435_v29 = vpop.f32.mrb[7].mxu1 }
 0x188   :  { %v282_v24 = vadd.f32 %v280_v16, %v276_v7  ;;  %v281_v30 = vmul.f32 %v279_v28, %v232_v15  ;;  %v317_v31 = vadd.f32 %v315_v12, %v311_v8  ;;  %v352_v32 = vadd.f32 %v350_v13, %v346_v9 }
 0x189   :  { %v258_v33 = vmul.f32 0.17677669, %v256_v20  ;;  %v257_v34 = vadd.f32 %v255_v21, %v251_v10  ;;  %v318_v35 = vadd.f32 %v316_v22, %v312_v18  ;;  %v353_v36 = vadd.f32 %v351_v23, %v347_v19 }
 0x18a   :  { %v284_v37 = vmul.f32 0.17677669, %v282_v24  ;;  %v283_v38 = vadd.f32 %v281_v30, %v277_v17  ;;  %v319_v25 = vmul.f32 0.17677669, %v317_v31  ;;  %v354_v27 = vmul.f32 0.17677669, %v352_v32 }
 0x18b   :  { %260 = vst.msk [vmem:[#allocation9] sm:$0xff] %vm48_vm2, %v258_v33  ;;  %v259_v39 = vmul.f32 0.17677669, %v257_v34  ;;  %v320_v26 = vmul.f32 0.17677669, %v318_v35 }
 0x18c   :  { %288 = vrot.lane.b32.xlu1 %v284_v37, %s536_s5  ;;  %v285_v40 = vmul.f32 0.17677669, %v283_v38  ;;  %v355_v28 = vmul.f32 0.17677669, %v353_v36 }
 0x18d   :  { %261 = vst.msk [vmem:[#allocation9 + $0x8] sm:$0xff] %vm48_vm2, %v259_v39 }
 0x18e   :  { %290 = vrot.lane.b32.xlu0 %v285_v40, %s536_s5 }
 0x190   :  { %323 = vrot.lane.b32.xlu1 %v319_v25, %s543_s11 }
 0x192   :  { %325 = vrot.lane.b32.xlu0 %v320_v26, %s543_s11 }
 0x194   :  { %358 = vrot.lane.b32.xlu1 %v354_v27, %s544_s12 }
 0x196   :  { %360 = vrot.lane.b32.xlu0 %v355_v28, %s544_s12 }
 0x1fe   :  { %v289_v41 = vpop.permute.xlu1 %288 }
 0x1ff   :  { %295 = vst.msk [vmem:[#allocation9] sm:$0xff] %vm294_vm3, %v289_v41 }
 0x200   :  { %v291_v42 = vpop.permute.xlu0 %290 }
 0x201   :  { %296 = vst.msk [vmem:[#allocation9 + $0x8] sm:$0xff] %vm294_vm3, %v291_v42 }
 0x202   :  { %v324_v43 = vpop.permute.xlu1 %323 }
 0x203   :  { %330 = vst.msk [vmem:[#allocation9] sm:$0xff] %vm329_vm4, %v324_v43 }
 0x204   :  { %v326_v44 = vpop.permute.xlu0 %325 }
 0x205   :  { %331 = vst.msk [vmem:[#allocation9 + $0x8] sm:$0xff] %vm329_vm4, %v326_v44 }
 0x206   :  { %v359_v45 = vpop.permute.xlu1 %358 }
 0x207   :  { %365 = vst.msk [vmem:[#allocation9] sm:$0xff] %vm364_vm5, %v359_v45 }
 0x208   :  { %v361_v46 = vpop.permute.xlu0 %360 }
 0x209   :  { %366 = vst.msk [vmem:[#allocation9 + $0x8] sm:$0xff] %vm364_vm5, %v361_v46 }
 0x20a   :  { %514 = shalt.err (!%p511_p9)
}
 0x20b   :  { %s515_s1 = scalar_lea.hbm %s683_s3, 256 }
 0x20c   :  { %p516_p10 = scmp.ne.s32.totalorder %s683_s3, %s515_s1  ;;  %p519_p11 = scmp.lt.u32.totalorder %s515_s1, %s683_s3 }
 0x20e   :  { %p521_p12 = pnand %p519_p11, %p516_p10 }
 0x210   :  { %524 = shalt.err (!%p521_p12)
}
 0x211   :  { %378 = dma.vmem_to_hbm [thread:$0]  %s373_s14, 256, %s683_s3, [#allocation6], %s535_s4, %s535_s4, %s536_s5  }
 0x212   :  { %531 = dma.done.wait [#allocation6], 256  }
 0x213   :  { %532 = vsyncadd [#allocation6], 4294967040 }
 0x214   :  { %382 = vsyncpa [#allocation5], 1 }
 0x215   :  { %383 = vsyncpa [#allocation8], 1 }
 0x216   :  { %384 = vsyncpa [#allocation6], 1 }

</bundles_post_ra>
